<compile_context>
chip_gen: v7x
topology: tpu7x:2x2x1
jax: 0.10.0
libtpu: 0.0.40
codegen_flags: <defaults>
</compile_context>

<pallas_src>
import functools

import jax
import jax.numpy as jnp
from jax.experimental import pallas as pl
from jax.experimental.pallas import tpu as pltpu


def _round_up(n, m):
    return ((n + m - 1) // m) * m


def _pad2d(a, rows, cols):
    r, c = a.shape
    if r == rows and c == cols:
        return a
    return jnp.pad(a, ((0, rows - r), (0, cols - c)))


def _mlp_kernel(x_ref, w1_ref, b1_ref, w2_ref, b2_ref, w3_ref, b3_ref, o_ref,
                *, precision):
    # Matmuls run on the MXU (bf16 or f32 inputs, f32 accumulate); bias-add and
    # ReLU stay in f32 on the VPU.
    h = jnp.dot(x_ref[...], w1_ref[...],
                preferred_element_type=jnp.float32, precision=precision)
    h = jnp.maximum(h + b1_ref[...], 0.0)
    h = jnp.dot(h.astype(w2_ref.dtype), w2_ref[...],
                preferred_element_type=jnp.float32, precision=precision)
    h = jnp.maximum(h + b2_ref[...], 0.0)
    o = jnp.dot(h.astype(w3_ref.dtype), w3_ref[...],
                preferred_element_type=jnp.float32, precision=precision)
    o_ref[...] = (o + b3_ref[...]).astype(o_ref.dtype)


@functools.partial(jax.jit, static_argnames=("block_b", "compute_dtype", "precision"))
def net_forward(x, params, block_b=512, compute_dtype=None, precision=None):
    """Pallas equivalent of Net.forward(x, t) -> (net_n(x), None).

    block_b:       target batch tile (rows).  Small batches collapse to one tile.
    compute_dtype: dtype fed to the MXU (e.g. jnp.bfloat16 on v6e/v7x).
                   Biases / epilogue / output stay f32.
    precision:     jax.lax.Precision for the dots.  Defaults to HIGHEST when
                   the matmul inputs are f32 (PyTorch fp32 parity).
    """
    (w1, b1), (w2, b2), (w3, b3) = params
    B, n_in = x.shape
    nh = w1.shape[1]
    n_out = w3.shape[1]

    LANE = 128
    n_in_p = _round_up(n_in, LANE)
    nh_p = _round_up(nh, LANE)
    n_out_p = _round_up(n_out, LANE)

    dt = compute_dtype if compute_dtype is not None else x.dtype
    if precision is None and jnp.dtype(dt) == jnp.dtype(jnp.float32):
        precision = jax.lax.Precision.HIGHEST

    # Batch tiling: big tiles amortize the ~0.35us/step pipeline overhead, but
    # never pad tiny batches up to a huge tile.  Tile rows are a multiple of 8
    # (sublane granularity; a multiple of 16 once >= 16, covering bf16 packing).
    bb = _round_up(min(block_b, _round_up(B, 8)), 8)
    B_p = _round_up(B, bb)
    grid = (B_p // bb,)

    xp = _pad2d(x, B_p, n_in_p).astype(dt)
    w1p = _pad2d(w1, n_in_p, nh_p).astype(dt)
    w2p = _pad2d(w2, nh_p, nh_p).astype(dt)
    w3p = _pad2d(w3, nh_p, n_out_p).astype(dt)
    b1p = _pad2d(b1, 1, nh_p).astype(jnp.float32)
    b2p = _pad2d(b2, 1, nh_p).astype(jnp.float32)
    b3p = _pad2d(b3, 1, n_out_p).astype(jnp.float32)

    # Constant block index -> Mosaic keeps weights/biases resident across steps.
    weight_spec = lambda shape: pl.BlockSpec(shape, lambda i: (0, 0))

    out = pl.pallas_call(
        functools.partial(_mlp_kernel, precision=precision),
        out_shape=jax.ShapeDtypeStruct((B_p, n_out_p), jnp.float32),
        grid_spec=pltpu.PrefetchScalarGridSpec(
            num_scalar_prefetch=0,
            grid=grid,
            in_specs=[
                pl.BlockSpec((bb, n_in_p), lambda i: (i, 0)),  # x tile
                weight_spec((n_in_p, nh_p)),    # W1 (pre-transposed, padded)
                weight_spec((1, nh_p)),         # b1
                weight_spec((nh_p, nh_p)),      # W2
                weight_spec((1, nh_p)),         # b2
                weight_spec((nh_p, n_out_p)),   # W3
                weight_spec((1, n_out_p)),      # b3
            ],
            out_specs=pl.BlockSpec((bb, n_out_p), lambda i: (i, 0)),
        ),
        compiler_params=pltpu.CompilerParams(
            dimension_semantics=("parallel",)),
    )(xp, w1p, b1p, w2p, b2p, w3p, b3p)

    # Strip batch / lane padding.  Second return mirrors the module's `None`.
    return out[:B, :n_out], None


def init_linear(key, fan_in, fan_out):
    """nn.Linear-style init U(-1/sqrt(fan_in), 1/sqrt(fan_in)).

    Returns W already transposed to [fan_in, fan_out] for the kernel layout.
    """
    kw, kb = jax.random.split(key)
    bound = 1.0 / jnp.sqrt(jnp.float32(fan_in))
    w = jax.random.uniform(kw, (fan_in, fan_out), jnp.float32, -bound, bound)
    b = jax.random.uniform(kb, (1, fan_out), jnp.float32, -bound, bound)
    return w, b


if __name__ == "__main__":
    # Small shapes consistent with the module:
    #   args.n_layers = 2, args.n_hiddens = 32, n_inputs = 32, n_outputs = 10.
    # Batch of 10 deliberately not a multiple of the tile -> exercises padding.
    batch, n_inputs, n_hiddens, n_outputs = 10, 32, 32, 10

    root = jax.random.PRNGKey(0)
    kx, k1, k2, k3 = jax.random.split(root, 4)

    x = jax.random.normal(kx, (batch, n_inputs), jnp.float32)
    params = (
        init_linear(k1, n_inputs, n_hiddens),
        init_linear(k2, n_hiddens, n_hiddens),
        init_linear(k3, n_hiddens, n_outputs),
    )
    (w1, b1), (w2, b2), (w3, b3) = params

    # --- f32 path (defaults to HIGHEST precision -> PyTorch fp32 parity) ---
    out, aux = net_forward(x, params)
    out = jax.block_until_ready(out)
    assert out.shape == (batch, n_outputs) and aux is None

    hp = jax.lax.Precision.HIGHEST
    ref = jnp.maximum(jnp.dot(x, w1, precision=hp) + b1, 0.0)
    ref = jnp.maximum(jnp.dot(ref, w2, precision=hp) + b2, 0.0)
    ref = jnp.dot(ref, w3, precision=hp) + b3
    assert jnp.allclose(out, ref, atol=1e-5, rtol=1e-5)

    # --- bf16 matmul path (recommended on v6e/v7x), multi-step batch grid ---
    xb = jax.random.normal(kx, (48, n_inputs), jnp.float32)
    out_bf, _ = net_forward(xb, params, block_b=16, compute_dtype=jnp.bfloat16)
    out_bf = jax.block_until_ready(out_bf)
    refb = jnp.maximum(xb @ w1 + b1, 0.0)
    refb = jnp.maximum(refb @ w2 + b2, 0.0)
    refb = refb @ w3 + b3
    assert out_bf.shape == (48, n_outputs)
    assert jnp.allclose(out_bf, refb, atol=5e-2, rtol=5e-2)

    # TODO(synk): training machinery (observe/getBatch, CE/MSE/L1 losses, SGD,
    # replay memory, exchange) is host-side logic, not part of the forward kernel.
    print("KERNEL_OK")
</pallas_src>

<mosaic_0001>
module attributes {stable_mosaic.version = 11 : i64} {
  func.func @_mlp_kernel(%arg0: i32, %arg1: memref<16x128xf32, #tpu.memory_space<vmem>>, %arg2: memref<128x128xf32, #tpu.memory_space<vmem>>, %arg3: memref<1x128xf32, #tpu.memory_space<vmem>>, %arg4: memref<128x128xf32, #tpu.memory_space<vmem>>, %arg5: memref<1x128xf32, #tpu.memory_space<vmem>>, %arg6: memref<128x128xf32, #tpu.memory_space<vmem>>, %arg7: memref<1x128xf32, #tpu.memory_space<vmem>>, %arg8: memref<16x128xf32, #tpu.memory_space<vmem>>) attributes {dimension_semantics = [#tpu.dimension_semantics<parallel>], iteration_bounds = array<i64: 1>, scalar_prefetch = 0 : i64, scratch_operands = 0 : i64, tpu.core_type = #tpu.core_type<tc>, window_params = [{transform_indices = @transform_0, window_bounds = array<i64: 16, 128>}, {pipeline_mode = #tpu.pipeline_mode<synchronous>, transform_indices = @transform_1, window_bounds = array<i64: 128, 128>}, {pipeline_mode = #tpu.pipeline_mode<synchronous>, transform_indices = @transform_2, window_bounds = array<i64: 1, 128>}, {pipeline_mode = #tpu.pipeline_mode<synchronous>, transform_indices = @transform_3, window_bounds = array<i64: 128, 128>}, {pipeline_mode = #tpu.pipeline_mode<synchronous>, transform_indices = @transform_4, window_bounds = array<i64: 1, 128>}, {pipeline_mode = #tpu.pipeline_mode<synchronous>, transform_indices = @transform_5, window_bounds = array<i64: 128, 128>}, {pipeline_mode = #tpu.pipeline_mode<synchronous>, transform_indices = @transform_6, window_bounds = array<i64: 1, 128>}, {transform_indices = @transform_7, window_bounds = array<i64: 16, 128>}]} {
    %c0 = arith.constant 0 : index
    %c0_0 = arith.constant 0 : index
    %0 = vector.load %arg1[%c0, %c0_0] : memref<16x128xf32, #tpu.memory_space<vmem>>, vector<16x128xf32>
    %c0_1 = arith.constant 0 : index
    %c0_2 = arith.constant 0 : index
    %1 = vector.load %arg2[%c0_1, %c0_2] : memref<128x128xf32, #tpu.memory_space<vmem>>, vector<128x128xf32>
    %cst = arith.constant dense<0.000000e+00> : vector<16x128xf32>
    %2 = tpu.matmul %0, %1, %cst {dimension_numbers = #tpu.dot_dimension_numbers<[1], [0], [0], [1], [0, 0, 1, 1], [], []>, precision = #tpu.contract_precision<fp32>} : vector<16x128xf32>, vector<128x128xf32>, vector<16x128xf32> -> vector<16x128xf32>
    %c0_3 = arith.constant 0 : index
    %c0_4 = arith.constant 0 : index
    %3 = vector.load %arg3[%c0_3, %c0_4] : memref<1x128xf32, #tpu.memory_space<vmem>>, vector<1x128xf32>
    %4 = vector.broadcast %3 : vector<1x128xf32> to vector<16x128xf32>
    %5 = arith.addf %2, %4 : vector<16x128xf32>
    %cst_5 = arith.constant 0.000000e+00 : f32
    %6 = vector.broadcast %cst_5 : f32 to vector<16x128xf32>
    %7 = arith.maximumf %5, %6 : vector<16x128xf32>
    %c0_6 = arith.constant 0 : index
    %c0_7 = arith.constant 0 : index
    %8 = vector.load %arg4[%c0_6, %c0_7] : memref<128x128xf32, #tpu.memory_space<vmem>>, vector<128x128xf32>
    %cst_8 = arith.constant dense<0.000000e+00> : vector<16x128xf32>
    %9 = tpu.matmul %7, %8, %cst_8 {dimension_numbers = #tpu.dot_dimension_numbers<[1], [0], [0], [1], [0, 0, 1, 1], [], []>, precision = #tpu.contract_precision<fp32>} : vector<16x128xf32>, vector<128x128xf32>, vector<16x128xf32> -> vector<16x128xf32>
    %c0_9 = arith.constant 0 : index
    %c0_10 = arith.constant 0 : index
    %10 = vector.load %arg5[%c0_9, %c0_10] : memref<1x128xf32, #tpu.memory_space<vmem>>, vector<1x128xf32>
    %11 = vector.broadcast %10 : vector<1x128xf32> to vector<16x128xf32>
    %12 = arith.addf %9, %11 : vector<16x128xf32>
    %cst_11 = arith.constant 0.000000e+00 : f32
    %13 = vector.broadcast %cst_11 : f32 to vector<16x128xf32>
    %14 = arith.maximumf %12, %13 : vector<16x128xf32>
    %c0_12 = arith.constant 0 : index
    %c0_13 = arith.constant 0 : index
    %15 = vector.load %arg6[%c0_12, %c0_13] : memref<128x128xf32, #tpu.memory_space<vmem>>, vector<128x128xf32>
    %cst_14 = arith.constant dense<0.000000e+00> : vector<16x128xf32>
    %16 = tpu.matmul %14, %15, %cst_14 {dimension_numbers = #tpu.dot_dimension_numbers<[1], [0], [0], [1], [0, 0, 1, 1], [], []>, precision = #tpu.contract_precision<fp32>} : vector<16x128xf32>, vector<128x128xf32>, vector<16x128xf32> -> vector<16x128xf32>
    %c0_15 = arith.constant 0 : index
    %c0_16 = arith.constant 0 : index
    %17 = vector.load %arg7[%c0_15, %c0_16] : memref<1x128xf32, #tpu.memory_space<vmem>>, vector<1x128xf32>
    %18 = vector.broadcast %17 : vector<1x128xf32> to vector<16x128xf32>
    %19 = arith.addf %16, %18 : vector<16x128xf32>
    %c0_17 = arith.constant 0 : index
    %c0_18 = arith.constant 0 : index
    %20 = vector.load %arg8[%c0_17, %c0_18] : memref<16x128xf32, #tpu.memory_space<vmem>>, vector<16x128xf32>
    tpu.vector_store %arg8[%c0_17, %c0_18], %19 {strides = array<i32>} : memref<16x128xf32, #tpu.memory_space<vmem>>, vector<16x128xf32>,
    return
  }
  func.func @transform_0(%arg0: i32) -> (i32, i32) {
    %c0_i32 = arith.constant 0 : i32
    %c0_i32_0 = arith.constant 0 : i32
    return %arg0, %c0_i32 : i32, i32
  }
  func.func @transform_1(%arg0: i32) -> (i32, i32) {
    %c0_i32 = arith.constant 0 : i32
    %c0_i32_0 = arith.constant 0 : i32
    %c0_i32_1 = arith.constant 0 : i32
    return %c0_i32, %c0_i32_0 : i32, i32
  }
  func.func @transform_2(%arg0: i32) -> (i32, i32) {
    %c0_i32 = arith.constant 0 : i32
    %c0_i32_0 = arith.constant 0 : i32
    %c0_i32_1 = arith.constant 0 : i32
    return %c0_i32, %c0_i32_0 : i32, i32
  }
  func.func @transform_3(%arg0: i32) -> (i32, i32) {
    %c0_i32 = arith.constant 0 : i32
    %c0_i32_0 = arith.constant 0 : i32
    %c0_i32_1 = arith.constant 0 : i32
    return %c0_i32, %c0_i32_0 : i32, i32
  }
  func.func @transform_4(%arg0: i32) -> (i32, i32) {
    %c0_i32 = arith.constant 0 : i32
    %c0_i32_0 = arith.constant 0 : i32
    %c0_i32_1 = arith.constant 0 : i32
    return %c0_i32, %c0_i32_0 : i32, i32
  }
  func.func @transform_5(%arg0: i32) -> (i32, i32) {
    %c0_i32 = arith.constant 0 : i32
    %c0_i32_0 = arith.constant 0 : i32
    %c0_i32_1 = arith.constant 0 : i32
    return %c0_i32, %c0_i32_0 : i32, i32
  }
  func.func @transform_6(%arg0: i32) -> (i32, i32) {
    %c0_i32 = arith.constant 0 : i32
    %c0_i32_0 = arith.constant 0 : i32
    %c0_i32_1 = arith.constant 0 : i32
    return %c0_i32, %c0_i32_0 : i32, i32
  }
  func.func @transform_7(%arg0: i32) -> (i32, i32) {
    %c0_i32 = arith.constant 0 : i32
    %c0_i32_0 = arith.constant 0 : i32
    return %arg0, %c0_i32 : i32, i32
  }
}

</mosaic_0001>

<bundles_post_ra>
// kernel: net_forward.1
= control target key start
LH: loop header
LB: loop body
LE: loop exit
PB: predicated region body
PF: predicated region fallthrough
CT: control target
= control target key end

     0   :  { %s4912_s0 = inlined_call_operand.vmem [shape: f32[16,128], index: 0, kind: input, shape index: {}]   ;;  %s4913_s1 = inlined_call_operand.vmem [shape: f32[128,128], index: 1, kind: input, shape index: {}]   ;;  %s4914_s2 = inlined_call_operand.vmem [shape: f32[1,128], index: 2, kind: input, shape index: {}]   ;;  %s4915_s3 = inlined_call_operand.vmem [shape: f32[128,128], index: 3, kind: input, shape index: {}]   ;;  %s4916_s4 = inlined_call_operand.vmem [shape: f32[1,128], index: 4, kind: input, shape index: {}]   ;;  %s4917_s5 = inlined_call_operand.vmem [shape: f32[128,128], index: 5, kind: input, shape index: {}]   ;;  %s4918_s6 = inlined_call_operand.vmem [shape: f32[1,128], index: 6, kind: input, shape index: {}]   ;;  %s4919_s7 = inlined_call_operand.hbm [shape: f32[16,128], index: 7, kind: output, shape index: {}]  }
   0x1   :  { %v29_v0 = vld [vmem:[%s4913_s1] sm:$0xff]  ;;  %v30_v1 = vld [vmem:[%s4913_s1 + $0x8] sm:$0xff]  ;;  %v31_v2 = vld [vmem:[%s4913_s1 + $0x10] sm:$0xff] }
   0x2   :  { %v53_v3 = vand.u32 4294901760, %v29_v0  ;;  %v56_v4 = vand.u32 4294901760, %v30_v1  ;;  %v3823_v5 = vld [vmem:[%s4913_s1 + $0x18] sm:$0xff]  ;;  %v59_v6 = vand.u32 4294901760, %v31_v2  ;;  %v3828_v7 = vld [vmem:[%s4913_s1 + $0x20] sm:$0xff]  ;;  %v3833_v8 = vld [vmem:[%s4913_s1 + $0x28] sm:$0xff] }
   0x3   :  { %v62_v9 = vand.u32 4294901760, %v3823_v5  ;;  %v65_v11 = vand.u32 4294901760, %v3828_v7  ;;  %v68_v12 = vand.u32 4294901760, %v3833_v8  ;;  %v3845_v14 = vld [vmem:[%s4913_s1 + $0x30] sm:$0xff]  ;;  %v3850_v15 = vld [vmem:[%s4913_s1 + $0x38] sm:$0xff]  ;;  %v27_v16 = vld [vmem:[%s4912_s0] sm:$0xff] }
   0x4   :  { %v3836_v10 = vpack.c.bf16 %v56_v4, %v53_v3  ;;  %v3859_v17 = vand.u32 4294901760, %v27_v16  ;;  %v71_v19 = vand.u32 4294901760, %v3845_v14  ;;  %v74_v20 = vand.u32 4294901760, %v3850_v15  ;;  %v3874_v21 = vld [vmem:[%s4913_s1 + $0x40] sm:$0xff]  ;;  %v3879_v22 = vld [vmem:[%s4913_s1 + $0x48] sm:$0xff] }
   0x5   :  { %v3840_v13 = vpack.c.bf16 %v62_v9, %v59_v6  ;;  %v3867_v18 = vpack.c.bf16 %v68_v12, %v65_v11 }
   0x6   :  { %3130 = vmatprep.subr.bf16.mxu1 %v3836_v10  ;;  %3226 = vmatprep.subr.bf16.mxu0 %v3836_v10  ;;  %v3882_v23 = vsub.f32 %v27_v16, %v3859_v17 }
   0x7   :  { %3132 = vmatpush3.bf16.msra.mxu1 %v3836_v10  ;;  %3228 = vmatpush3.bf16.msra.mxu0 %v3836_v10 }
   0x8   :  { %3134 = vmatprep.subr.bf16.mxu1 %v3840_v13  ;;  %3230 = vmatprep.subr.bf16.mxu0 %v3840_v13 }
   0x9   :  { %12 = vsyncpa [#allocation3], 0  ;;  %v135_v24 = vand.u32 4294901760, %v3882_v23  ;;  %v3893_v25 = vpack.c.bf16 %v74_v20, %v71_v19  ;;  %v77_v26 = vand.u32 4294901760, %v3874_v21  ;;  %v80_v27 = vand.u32 4294901760, %v3879_v22  ;;  %v3900_v28 = vld [vmem:[%s4913_s1 + $0x50] sm:$0xff] }
   0xa   :  { %v3905_v29 = vld [vmem:[%s4913_s1 + $0x58] sm:$0xff]  ;;  %v83_v31 = vand.u32 4294901760, %v3900_v28  ;;  %v28_v33 = vld [vmem:[%s4912_s0 + $0x8] sm:$0xff]  ;;  %v3926_v36 = vld [vmem:[%s4913_s1 + $0x60] sm:$0xff]  ;;  %v3933_v38 = vsub.f32 %v29_v0, %v53_v3  ;;  %v3935_v39 = vsub.f32 %v30_v1, %v56_v4  ;;  %v3953_v45 = vsub.f32 %v31_v2, %v59_v6  ;;  %s3768_s26 = smov [#allocation2]  }
   0xb   :  { %3136 = vmatpush3.bf16.msra.mxu1 %v3840_v13  ;;  %3232 = vmatpush3.bf16.msra.mxu0 %v3840_v13  ;;  %v136_v30 = vsub.f32 %v3882_v23, %v135_v24  ;;  %v3920_v34 = vpack.c.bf16 %v80_v27, %v77_v26  ;;  %v86_v35 = vand.u32 4294901760, %v3905_v29  ;;  %v3931_v37 = vld [vmem:[%s4913_s1 + $0x68] sm:$0xff]  ;;  %v3937_v40 = vand.u32 4294901760, %v28_v33  ;;  %v3946_v43 = vld [vmem:[%s4913_s1 + $0x70] sm:$0xff]  ;;  %v3951_v44 = vld [vmem:[%s4913_s1 + $0x78] sm:$0xff]  ;;  %s2161_s27 = sshll.u32 %s3768_s26, 4  ;;  %s2162_s27 = int_to_ptr.vmem [resolvable:$true] %s2161_s27 }
   0xc   :  { %3138 = vmatprep.subr.bf16.mxu1 %v3867_v18  ;;  %3234 = vmatprep.subr.bf16.mxu0 %v3867_v18  ;;  %v89_v41 = vand.u32 4294901760, %v3926_v36  ;;  %v92_v42 = vand.u32 4294901760, %v3931_v37  ;;  %v156_v47 = vand.u32 4294901760, %v3933_v38  ;;  %v163_v48 = vand.u32 4294901760, %v3935_v39  ;;  %s3744_s28 = scalar_lea.vmem %s2162_s27, 256  ;;  %p3749_p1 = scmp.lt.s32.totalorder %s2162_s27, %s2162_s27 }
   0xd   :  { %2636 = vmatprep.mubr.f32.mxu0 %v135_v24  ;;  %v137_v32 = vand.u32 4294901760, %v136_v30  ;;  %v3961_v46 = vpack.c.bf16 %v86_v35, %v83_v31  ;;  %v3966_v49 = vsub.f32 %v3823_v5, %v62_v9  ;;  %v95_v50 = vand.u32 4294901760, %v3946_v43  ;;  %p3745_p0 = scmp.ne.s32.totalorder %s2162_s27, %s3744_s28  ;;  %p3750_p2 = scmp.lt.s32.totalorder %s3744_s28, %s3744_s28 }
   0xe   :  { %v98_v51 = vand.u32 4294901760, %v3951_v44  ;;  %v3971_v52 = vsub.f32 %v28_v33, %v3937_v40  ;;  %v3979_v53 = vpack.c.bf16 %v92_v42, %v89_v41  ;;  %v170_v54 = vand.u32 4294901760, %v3953_v45 }
   0xf   :  { %3140 = vmatpush3.bf16.msra.mxu1 %v3867_v18  ;;  %3236 = vmatpush3.bf16.msra.mxu0 %v3867_v18  ;;  %v3985_v55 = vsub.f32 %v3828_v7, %v65_v11  ;;  %v157_v56 = vsub.f32 %v3933_v38, %v156_v47  ;;  %v164_v57 = vsub.f32 %v3935_v39, %v163_v48  ;;  %v177_v58 = vand.u32 4294901760, %v3966_v49  ;;  %p3751_p3 = por %p3750_p2, %p3749_p1 }
  0x10   :  { %3142 = vmatprep.subr.bf16.mxu1 %v3893_v25  ;;  %3238 = vmatprep.subr.bf16.mxu0 %v3893_v25  ;;  %v3995_v59 = vsub.f32 %v3833_v8, %v68_v12  ;;  %v4001_v60 = vpack.c.bf16 %v98_v51, %v95_v50  ;;  %v145_v61 = vand.u32 4294901760, %v3971_v52  ;;  %v171_v62 = vsub.f32 %v3953_v45, %v170_v54 }
  0x11   :  { %2531 = vmatprep.mubr.f32.mxu1 %v137_v32  ;;  %v184_v63 = vand.u32 4294901760, %v3985_v55  ;;  %v4011_v0 = vsub.f32 %v3845_v14, %v71_v19  ;;  %v4016_v1 = vsub.f32 %v3850_v15, %v74_v20  ;;  %v158_v2 = vand.u32 4294901760, %v157_v56  ;;  %p3752_p4 = pnand %p3751_p3, %p3745_p0 }
  0x12   :  { %v165_v3 = vand.u32 4294901760, %v164_v57  ;;  %v178_v4 = vsub.f32 %v3966_v49, %v177_v58  ;;  %v191_v5 = vand.u32 4294901760, %v3995_v59  ;;  %v3257_v6 = vpack.c.bf16 %v163_v48, %v156_v47 }
  0x13   :  { %3144 = vmatpush3.bf16.msra.mxu1 %v3893_v25  ;;  %3240 = vmatpush3.bf16.msra.mxu0 %v3893_v25  ;;  %v146_v7 = vsub.f32 %v3971_v52, %v145_v61  ;;  %v4026_v8 = vsub.f32 %v3874_v21, %v77_v26  ;;  %v172_v9 = vand.u32 4294901760, %v171_v62  ;;  %v185_v11 = vsub.f32 %v3985_v55, %v184_v63 }
  0x14   :  { %3146 = vmatprep.subr.bf16.mxu1 %v3920_v34  ;;  %3242 = vmatprep.subr.bf16.mxu0 %v3920_v34  ;;  %v198_v12 = vand.u32 4294901760, %v4011_v0  ;;  %v205_v14 = vand.u32 4294901760, %v4016_v1  ;;  %v3161_v15 = vpack.c.bf16 %v165_v3, %v158_v2  ;;  %v179_v16 = vand.u32 4294901760, %v178_v4 }
  0x15   :  { %v192_v19 = vsub.f32 %v3995_v59, %v191_v5  ;;  %v4039_v20 = vsub.f32 %v3879_v22, %v80_v27  ;;  %v147_v21 = vand.u32 4294901760, %v146_v7  ;;  %v3261_v24 = vpack.c.bf16 %v177_v58, %v170_v54 }
  0x16   :  { %v212_v26 = vand.u32 4294901760, %v4026_v8  ;;  %v4045_v30 = vsub.f32 %v3900_v28, %v83_v31  ;;  %v199_v32 = vsub.f32 %v4011_v0, %v198_v12  ;;  %v206_v33 = vsub.f32 %v4016_v1, %v205_v14 }
  0x17   :  { %3148 = vmatpush3.bf16.msra.mxu1 %v3920_v34  ;;  %3244 = vmatpush3.bf16.msra.mxu0 %v3920_v34  ;;  %v4054_v22 = vsub.f32 %v3905_v29, %v86_v35  ;;  %v3165_v27 = vpack.c.bf16 %v179_v16, %v172_v9  ;;  %v186_v47 = vand.u32 4294901760, %v185_v11  ;;  %v193_v48 = vand.u32 4294901760, %v192_v19 }
  0x18   :  { %3150 = vmatprep.subr.bf16.mxu1 %v3961_v46  ;;  %3246 = vmatprep.subr.bf16.mxu0 %v3961_v46  ;;  %v219_v28 = vand.u32 4294901760, %v4039_v20  ;;  %v3265_v31 = vpack.c.bf16 %v191_v5, %v184_v63  ;;  %v213_v54 = vsub.f32 %v4026_v8, %v212_v26  ;;  %v4061_v56 = vsub.f32 %v3926_v36, %v89_v41 }
  0x19   :  { %v200_v29 = vand.u32 4294901760, %v199_v32  ;;  %v207_v35 = vand.u32 4294901760, %v206_v33  ;;  %v226_v57 = vand.u32 4294901760, %v4045_v30  ;;  %v233_v58 = vand.u32 4294901760, %v4054_v22 }
  0x1a   :  { %v3169_v62 = vpack.c.bf16 %v193_v48, %v186_v47  ;;  %v4069_v63 = vsub.f32 %v3931_v37, %v92_v42  ;;  %v3269_v36 = vpack.c.bf16 %v205_v14, %v198_v12  ;;  %v214_v41 = vand.u32 4294901760, %v213_v54 }
  0x1b   :  { %3152 = vmatpush3.bf16.msra.mxu1 %v3961_v46  ;;  %3248 = vmatpush3.bf16.msra.mxu0 %v3961_v46  ;;  %v3173_v2 = vpack.c.bf16 %v207_v35, %v200_v29  ;;  %v227_v3 = vsub.f32 %v4045_v30, %v226_v57  ;;  %v234_v4 = vsub.f32 %v4054_v22, %v233_v58  ;;  %v240_v5 = vand.u32 4294901760, %v4061_v56 }
  0x1c   :  { %3154 = vmatprep.subr.bf16.mxu1 %v3979_v53  ;;  %3250 = vmatprep.subr.bf16.mxu0 %v3979_v53  ;;  %v247_v37 = vand.u32 4294901760, %v4069_v63  ;;  %v4080_v42 = vsub.f32 %v3946_v43, %v95_v50  ;;  %v4085_v7 = vsub.f32 %v3951_v44, %v98_v51  ;;  %v3273_v9 = vpack.c.bf16 %v219_v28, %v212_v26 }
  0x1d   :  { %v228_v11 = vand.u32 4294901760, %v227_v3  ;;  %v235_v12 = vand.u32 4294901760, %v234_v4  ;;  %v241_v14 = vsub.f32 %v4061_v56, %v240_v5  ;;  %v3277_v51 = vpack.c.bf16 %v233_v58, %v226_v57  ;;  %v747_v57 = vld [vmem:[%s4915_s3 + $0x48] sm:$0xff]  ;;  %v750_v4 = vld [vmem:[%s4915_s3 + $0x60] sm:$0xff] }
  0x1e   :  { %v248_v16 = vsub.f32 %v4069_v63, %v247_v37  ;;  %v254_v43 = vand.u32 4294901760, %v4080_v42  ;;  %v261_v50 = vand.u32 4294901760, %v4085_v7  ;;  %v3281_v33 = vpack.c.bf16 %v247_v37, %v240_v5  ;;  %v751_v5 = vld [vmem:[%s4915_s3 + $0x68] sm:$0xff] }
  0x1f   :  { %3156 = vmatpush3.bf16.msra.mxu1 %v3979_v53  ;;  %3252 = vmatpush3.bf16.msra.mxu0 %v3979_v53  ;;  %v3181_v44 = vpack.c.bf16 %v235_v12, %v228_v11  ;;  %v242_v19 = vand.u32 4294901760, %v241_v14  ;;  %v3197_v54 = vpack.c.bf16 %v3966_v49, %v3953_v45  ;;  %v4135_v49 = vld [vmem:[%s4915_s3 + $0x10] sm:$0xff]  ;;  %v801_v37 = vand.u32 4294901760, %v751_v5  ;;  %v753_v12 = vld [vmem:[%s4915_s3 + $0x78] sm:$0xff] }
  0x20   :  { %3158 = vmatprep.subr.bf16.mxu1 %v4001_v60  ;;  %3254 = vmatprep.subr.bf16.mxu0 %v4001_v60  ;;  %v262_v26 = vsub.f32 %v4085_v7, %v261_v50  ;;  %v752_v11 = vld [vmem:[%s4915_s3 + $0x70] sm:$0xff] }
  0x21   :  { %v804_v14 = vand.u32 4294901760, %v752_v11 }
  0x22   :  { %v263_v47 = vand.u32 4294901760, %v262_v26 }
  0x23   :  { %3160 = vmatpush3.bf16.msra.mxu1 %v4001_v60  ;;  %3256 = vmatpush3.bf16.msra.mxu0 %v4001_v60 }
  0x24   :  { %3162 = vmatprep.subr.bf16.mxu1 %v3161_v15  ;;  %3258 = vmatprep.subr.bf16.mxu0 %v3257_v6 }
  0x26   :  { %2532 = vmatmul.mubr.f32.vlgmr.msra.gmra.mrb[0].mxu1 %v147_v21  ;;  %2637 = vmatmul.mubr.f32.vlgmr.msra.gmra.mrb[0].mxu0 %v145_v61  ;;  %v220_v61 = vsub.f32 %v4039_v20, %v219_v28  ;;  %v249_v21 = vand.u32 4294901760, %v248_v16  ;;  %v3285_v28 = vpack.c.bf16 %v261_v50, %v254_v43 }
  0x27   :  { %3164 = vmatpush3.bf16.msra.mxu1 %v3161_v15  ;;  %3260 = vmatpush3.bf16.msra.mxu0 %v3257_v6 }
  0x28   :  { %3166 = vmatprep.subr.bf16.mxu1 %v3165_v27  ;;  %3262 = vmatprep.subr.bf16.mxu0 %v3261_v24  ;;  %v221_v6 = vand.u32 4294901760, %v220_v61  ;;  %v3185_v32 = vpack.c.bf16 %v249_v21, %v242_v19 }
  0x29   :  { %2566 = vmatprep.mubr.f32.mxu1 %v3859_v17  ;;  %2671 = vmatprep.mubr.f32.mxu0 %v3859_v17 }
  0x2a   :  { %v3177_v15 = vpack.c.bf16 %v221_v6, %v214_v41  ;;  %v798_v6 = vand.u32 4294901760, %v750_v4 }
  0x2b   :  { %3168 = vmatpush3.bf16.msra.mxu1 %v3165_v27  ;;  %3264 = vmatpush3.bf16.msra.mxu0 %v3261_v24  ;;  %v255_v24 = vsub.f32 %v4080_v42, %v254_v43 }
  0x2c   :  { %3170 = vmatprep.subr.bf16.mxu1 %v3169_v62  ;;  %3266 = vmatprep.subr.bf16.mxu0 %v3265_v31 }
  0x2d   :  { %v256_v27 = vand.u32 4294901760, %v255_v24 }
  0x2f   :  { %3172 = vmatpush3.bf16.msra.mxu1 %v3169_v62  ;;  %3268 = vmatpush3.bf16.msra.mxu0 %v3265_v31  ;;  %v3189_v48 = vpack.c.bf16 %v263_v47, %v256_v27  ;;  %v3193_v31 = vpack.c.bf16 %v3935_v39, %v3933_v38  ;;  %v3201_v38 = vpack.c.bf16 %v3995_v59, %v3985_v55  ;;  %v4140_v55 = vld [vmem:[%s4915_s3 + $0x18] sm:$0xff]  ;;  %v768_v59 = vand.u32 4294901760, %v4135_v49 }
  0x30   :  { %3174 = vmatprep.subr.bf16.mxu1 %v3173_v2  ;;  %3270 = vmatprep.subr.bf16.mxu0 %v3269_v36  ;;  %v3205_v39 = vpack.c.bf16 %v4016_v1, %v4011_v0  ;;  %v771_v0 = vand.u32 4294901760, %v4140_v55  ;;  %v4151_v1 = vld [vmem:[%s4915_s3 + $0x20] sm:$0xff]  ;;  %v789_v62 = vand.u32 4294901760, %v747_v57 }
  0x33   :  { %3176 = vmatpush3.bf16.msra.mxu1 %v3173_v2  ;;  %3272 = vmatpush3.bf16.msra.mxu0 %v3269_v36  ;;  %v749_v36 = vld [vmem:[%s4915_s3 + $0x58] sm:$0xff] }
  0x34   :  { %3178 = vmatprep.subr.bf16.mxu1 %v3177_v15  ;;  %3274 = vmatprep.subr.bf16.mxu0 %v3273_v9  ;;  %v795_v2 = vand.u32 4294901760, %v749_v36 }
  0x37   :  { %3180 = vmatpush3.bf16.msra.mxu1 %v3177_v15  ;;  %3276 = vmatpush3.bf16.msra.mxu0 %v3273_v9  ;;  %v807_v15 = vand.u32 4294901760, %v753_v12 }
  0x38   :  { %3182 = vmatprep.subr.bf16.mxu1 %v3181_v44  ;;  %3278 = vmatprep.subr.bf16.mxu0 %v3277_v51 }
  0x39   :  { %v4243_v50 = vpack.c.bf16 %v807_v15, %v804_v14 }
  0x3b   :  { %3184 = vmatpush3.bf16.msra.mxu1 %v3181_v44  ;;  %3280 = vmatpush3.bf16.msra.mxu0 %v3277_v51 }
  0x3c   :  { %3186 = vmatprep.subr.bf16.mxu1 %v3185_v32  ;;  %3282 = vmatprep.subr.bf16.mxu0 %v3281_v33 }
  0x3f   :  { %3188 = vmatpush3.bf16.msra.mxu1 %v3185_v32  ;;  %3284 = vmatpush3.bf16.msra.mxu0 %v3281_v33  ;;  %v4258_v32 = vsub.f32 %v747_v57, %v789_v62 }
  0x40   :  { %3190 = vmatprep.subr.bf16.mxu1 %v3189_v48  ;;  %3286 = vmatprep.subr.bf16.mxu0 %v3285_v28 }
  0x41   :  { %v928_v27 = vand.u32 4294901760, %v4258_v32 }
  0x43   :  { %3192 = vmatpush3.bf16.msra.mxu1 %v3189_v48  ;;  %3288 = vmatpush3.bf16.msra.mxu0 %v3285_v28  ;;  %v929_v48 = vsub.f32 %v4258_v32, %v928_v27 }
  0x44   :  { %3194 = vmatprep.subr.bf16.mxu1 %v3193_v31  ;;  %3290 = vmatprep.subr.bf16.mxu0 %v3836_v10 }
  0x46   :  { %2567 = vmatmul.mubr.f32.vlgmr.msra.gmra.mrb[0].mxu1 %v3937_v40  ;;  %2672 = vmatmul.mubr.f32.vlgmr.msra.gmra.mrb[0].mxu0 %v3937_v40 }
  0x47   :  { %3196 = vmatpush3.bf16.msra.mxu1 %v3193_v31  ;;  %3292 = vmatpush3.bf16.msra.mxu0 %v3836_v10  ;;  %v3209_v10 = vpack.c.bf16 %v4039_v20, %v4026_v8  ;;  %v4156_v8 = vld [vmem:[%s4915_s3 + $0x28] sm:$0xff]  ;;  %v774_v20 = vand.u32 4294901760, %v4151_v1  ;;  %v4270_v31 = vsub.f32 %v749_v36, %v795_v2  ;;  %v4295_v36 = vsub.f32 %v753_v12, %v807_v15 }
  0x48   :  { %3198 = vmatprep.subr.bf16.mxu1 %v3197_v54  ;;  %3294 = vmatprep.subr.bf16.mxu0 %v3840_v13 }
  0x49   :  { %2601 = vmatprep.mubr.f32.mxu1 %v3882_v23  ;;  %2706 = vmatprep.mubr.f32.mxu0 %v3859_v17  ;;  %v3217_v17 = vpack.c.bf16 %v4069_v63, %v4061_v56  ;;  %v739_v23 = vld [vmem:[%s4915_s3 + $0x8] sm:$0xff]  ;;  %v748_v63 = vld [vmem:[%s4915_s3 + $0x50] sm:$0xff] }
  0x4a   :  { %v765_v45 = vand.u32 4294901760, %v739_v23  ;;  %v792_v41 = vand.u32 4294901760, %v748_v63 }
  0x4b   :  { %3200 = vmatpush3.bf16.msra.mxu1 %v3197_v54  ;;  %3296 = vmatpush3.bf16.msra.mxu0 %v3840_v13  ;;  %v3213_v13 = vpack.c.bf16 %v4054_v22, %v4045_v30  ;;  %v777_v30 = vand.u32 4294901760, %v4156_v8  ;;  %v4171_v22 = vld [vmem:[%s4915_s3 + $0x30] sm:$0xff] }
  0x4c   :  { %3202 = vmatprep.subr.bf16.mxu1 %v3201_v38  ;;  %3298 = vmatprep.subr.bf16.mxu0 %v3867_v18  ;;  %v780_v29 = vand.u32 4294901760, %v4171_v22  ;;  %v4217_v3 = vpack.c.bf16 %v795_v2, %v792_v41  ;;  %v4231_v9 = vsub.f32 %v739_v23, %v765_v45  ;;  %v4268_v28 = vsub.f32 %v748_v63, %v792_v41 }
  0x4d   :  { %v4186_v56 = vpack.c.bf16 %v777_v30, %v774_v20  ;;  %v4282_v23 = vsub.f32 %v750_v4, %v798_v6  ;;  %v4293_v63 = vsub.f32 %v752_v11, %v804_v14 }
  0x4e   :  { %v872_v43 = vand.u32 4294901760, %v4231_v9 }
  0x4f   :  { %3204 = vmatpush3.bf16.msra.mxu1 %v3201_v38  ;;  %3300 = vmatpush3.bf16.msra.mxu0 %v3867_v18  ;;  %v738_v18 = vld [vmem:[%s4915_s3] sm:$0xff]  ;;  %v930_v38 = vand.u32 4294901760, %v929_v48  ;;  %v4921_v4 = vand.u32 4294901760, %v4293_v63  ;;  %v4330_v48 = vpack.c.bf16 %v4295_v36, %v4293_v63 }
  0x50   :  { %3206 = vmatprep.subr.bf16.mxu1 %v3205_v39  ;;  %3302 = vmatprep.subr.bf16.mxu0 %v3893_v25  ;;  %v873_v51 = vsub.f32 %v4231_v9, %v872_v43 }
  0x52   :  { %v874_v21 = vand.u32 4294901760, %v873_v51 }
  0x53   :  { %3208 = vmatpush3.bf16.msra.mxu1 %v3205_v39  ;;  %3304 = vmatpush3.bf16.msra.mxu0 %v3893_v25  ;;  %v3221_v25 = vpack.c.bf16 %v4085_v7, %v4080_v42  ;;  %v4227_v42 = vpack.c.bf16 %v801_v37, %v798_v6  ;;  %v935_v39 = vand.u32 4294901760, %v4268_v28 }
  0x54   :  { %3210 = vmatprep.subr.bf16.mxu1 %v3209_v10  ;;  %3306 = vmatprep.subr.bf16.mxu0 %v3920_v34 }
  0x57   :  { %3212 = vmatpush3.bf16.msra.mxu1 %v3209_v10  ;;  %3308 = vmatpush3.bf16.msra.mxu0 %v3920_v34  ;;  %v762_v34 = vand.u32 4294901760, %v738_v18  ;;  %v4924_v10 = vand.u32 4294901760, %v4270_v31 }
  0x58   :  { %3214 = vmatprep.subr.bf16.mxu1 %v3213_v13  ;;  %3310 = vmatprep.subr.bf16.mxu0 %v3961_v46 }
  0x59   :  { %v4229_v7 = vsub.f32 %v738_v18, %v762_v34  ;;  %v943_v18 = vsub.f32 %v4270_v31, %v4924_v10 }
  0x5b   :  { %3216 = vmatpush3.bf16.msra.mxu1 %v3213_v13  ;;  %3312 = vmatpush3.bf16.msra.mxu0 %v3961_v46  ;;  %v4144_v46 = vpack.c.bf16 %v765_v45, %v762_v34  ;;  %v865_v16 = vand.u32 4294901760, %v4229_v7  ;;  %v944_v45 = vand.u32 4294901760, %v943_v18  ;;  %v4314_v51 = vpack.c.bf16 %v4231_v9, %v4229_v7 }
  0x5c   :  { %3218 = vmatprep.subr.bf16.mxu1 %v3217_v17  ;;  %3314 = vmatprep.subr.bf16.mxu0 %v3979_v53  ;;  %v4338_v18 = vsub.f32 %v4135_v49, %v768_v59  ;;  %v4350_v49 = vsub.f32 %v4151_v1, %v774_v20 }
  0x5d   :  { %v866_v44 = vsub.f32 %v4229_v7, %v865_v16 }
  0x5e   :  { %v893_v20 = vand.u32 4294901760, %v4350_v49 }
  0x5f   :  { %3220 = vmatpush3.bf16.msra.mxu1 %v3217_v17  ;;  %3316 = vmatpush3.bf16.msra.mxu0 %v3979_v53  ;;  %v4164_v53 = vpack.c.bf16 %v771_v0, %v768_v59  ;;  %v867_v19 = vand.u32 4294901760, %v866_v44  ;;  %v936_v17 = vsub.f32 %v4268_v28, %v935_v39 }
  0x60   :  { %3222 = vmatprep.subr.bf16.mxu1 %v3221_v25  ;;  %3318 = vmatprep.subr.bf16.mxu0 %v4001_v60 }
  0x61   :  { %v4253_v24 = vpack.c.bf16 %v874_v21, %v867_v19  ;;  %v937_v34 = vand.u32 4294901760, %v936_v17  ;;  %v4322_v21 = vpack.c.bf16 %v4270_v31, %v4268_v28 }
  0x63   :  { %3224 = vmatpush3.bf16.msra.mxu1 %v3221_v25  ;;  %3320 = vmatpush3.bf16.msra.mxu0 %v4001_v60  ;;  %v4176_v60 = vld [vmem:[%s4915_s3 + $0x38] sm:$0xff]  ;;  %v4284_v25 = vsub.f32 %v751_v5, %v801_v37  ;;  %v4920_v5 = vand.u32 4294901760, %v4295_v36  ;;  %v964_v37 = vsub.f32 %v4293_v63, %v4921_v4 }
  0x64   :  { %3322 = vmatprep.subr.bf16.mxu1 %v4144_v46  ;;  %v783_v35 = vand.u32 4294901760, %v4176_v60 }
  0x65   :  { %v4922_v57 = vand.u32 4294901760, %v4284_v25  ;;  %v971_v11 = vsub.f32 %v4295_v36, %v4920_v5  ;;  %v965_v14 = vand.u32 4294901760, %v964_v37 }
  0x66   :  { %2602 = vmatmul.mubr.f32.vlgmr.msra.gmra.mrb[0].mxu1 %v3971_v52  ;;  %2707 = vmatmul.mubr.f32.vlgmr.msra.gmra.mrb[0].mxu0 %v3937_v40  ;;  %v4196_v40 = vpack.c.bf16 %v783_v35, %v780_v29  ;;  %v746_v52 = vld [vmem:[%s4915_s3 + $0x40] sm:$0xff] }
  0x67   :  { %3324 = vmatpush3.bf16.msra.mxu1 %v4144_v46  ;;  %v786_v58 = vand.u32 4294901760, %v746_v52  ;;  %v957_v41 = vsub.f32 %v4284_v25, %v4922_v57  ;;  %v972_v15 = vand.u32 4294901760, %v971_v11  ;;  %v879_v11 = vand.u32 4294901760, %v4338_v18 }
  0x68   :  { %3326 = vmatprep.subr.bf16.mxu1 %v4164_v53 }
  0x69   :  { %v4207_v61 = vpack.c.bf16 %v789_v62, %v786_v58  ;;  %v4256_v26 = vsub.f32 %v746_v52, %v786_v58  ;;  %v4923_v52 = vand.u32 4294901760, %v4282_v23  ;;  %v4288_v58 = vpack.c.bf16 %v944_v45, %v937_v34 }
  0x6a   :  { %v958_v6 = vand.u32 4294901760, %v957_v41  ;;  %v4310_v44 = vpack.c.bf16 %v972_v15, %v965_v14  ;;  %v4343_v34 = vsub.f32 %v4140_v55, %v771_v0  ;;  %v4355_v55 = vsub.f32 %v4156_v8, %v777_v30 }
  0x6b   :  { %3328 = vmatpush3.bf16.msra.mxu1 %v4164_v53  ;;  %v921_v33 = vand.u32 4294901760, %v4256_v26  ;;  %v950_v62 = vsub.f32 %v4282_v23, %v4923_v52  ;;  %v4318_v19 = vpack.c.bf16 %v4258_v32, %v4256_v26  ;;  %v4375_v30 = vsub.f32 %v4171_v22, %v780_v29 }
  0x6c   :  { %3330 = vmatprep.subr.bf16.mxu1 %v4186_v56  ;;  %v886_v14 = vand.u32 4294901760, %v4343_v34  ;;  %v900_v8 = vand.u32 4294901760, %v4355_v55  ;;  %v4937_v32 = vand.u32 4294901760, %v4295_v36 }
  0x6d   :  { %v922_v47 = vsub.f32 %v4256_v26, %v921_v33  ;;  %v951_v2 = vand.u32 4294901760, %v950_v62  ;;  %v907_v29 = vand.u32 4294901760, %v4375_v30  ;;  %v4936_v26 = vand.u32 4294901760, %v4293_v63 }
  0x6e   :  { %v887_v1 = vsub.f32 %v4343_v34, %v886_v14  ;;  %v3457_v7 = vpack.c.bf16 %v900_v8, %v893_v20 }
  0x6f   :  { %3332 = vmatpush3.bf16.msra.mxu1 %v4186_v56  ;;  %v923_v54 = vand.u32 4294901760, %v922_v47  ;;  %v4308_v12 = vpack.c.bf16 %v958_v6, %v951_v2  ;;  %v4326_v47 = vpack.c.bf16 %v4284_v25, %v4282_v23  ;;  %v908_v52 = vsub.f32 %v4375_v30, %v907_v29 }
  0x70   :  { %3334 = vmatprep.subr.bf16.mxu1 %v4196_v40 }
  0x71   :  { %v4274_v13 = vpack.c.bf16 %v930_v38, %v923_v54  ;;  %v2172_v54 = vld [vmem:[%s4914_s2] ss:$0 sm:$0xff] }
  0x73   :  { %3336 = vmatpush3.bf16.msra.mxu1 %v4196_v40 }
  0x74   :  { %3338 = vmatprep.subr.bf16.mxu1 %v4207_v61 }
  0x77   :  { %3340 = vmatpush3.bf16.msra.mxu1 %v4207_v61 }
  0x78   :  { %3342 = vmatprep.subr.bf16.mxu1 %v4217_v3 }
  0x7b   :  { %3344 = vmatpush3.bf16.msra.mxu1 %v4217_v3 }
  0x7c   :  { %3346 = vmatprep.subr.bf16.mxu1 %v4227_v42 }
  0x7f   :  { %3348 = vmatpush3.bf16.msra.mxu1 %v4227_v42 }
  0x80   :  { %3350 = vmatprep.subr.bf16.mxu1 %v4243_v50 }
  0x83   :  { %3352 = vmatpush3.bf16.msra.mxu1 %v4243_v50 }
  0x84   :  { %3354 = vmatprep.subr.bf16.mxu1 %v4253_v24 }
 0x139   :  { %v2603_v38 = vpop.f32.mrb[0].mxu1  ;;  %v2708_v17 = vpop.f32.mrb[0].mxu0 }
 0x13a   :  { %v3705_v45 = vadd.f32 %v2603_v38, %v2172_v54  ;;  %v410_v62 = vpop.f32.mrb[1].mxu1  ;;  %v726_v41 = vpop.f32.mrb[1].mxu0  ;;  %v880_v38 = vsub.f32 %v4338_v18, %v879_v11 }
 0x13b   :  { %v3707_v2 = vadd.f32 %v2172_v54, %v410_v62 }
 0x13c   :  { %v3706_v6 = vadd.f32 %v3705_v45, %v2708_v17  ;;  %v4380_v45 = vsub.f32 %v4176_v60, %v783_v35  ;;  %v901_v60 = vsub.f32 %v4355_v55, %v900_v8 }
 0x13d   :  { %v3708_v37 = vadd.f32 %v3707_v2, %v726_v41 }
 0x13e   :  { %v737_v59 = vmax.f32 %v3706_v6, 0.0  ;;  %v881_v6 = vand.u32 4294901760, %v880_v38  ;;  %v914_v35 = vand.u32 4294901760, %v4380_v45  ;;  %v902_v57 = vand.u32 4294901760, %v901_v60 }
 0x13f   :  { %v736_v0 = vmax.f32 %v3708_v37, 0.0  ;;  %v888_v37 = vand.u32 4294901760, %v887_v1 }
 0x140   :  { %v4357_v15 = vand.u32 4294901760, %v737_v59  ;;  %v915_v10 = vsub.f32 %v4380_v45, %v914_v35  ;;  %v3461_v9 = vpack.c.bf16 %v914_v35, %v907_v29 }
 0x141   :  { %v4359_v54 = vand.u32 4294901760, %v736_v0  ;;  %v3357_v1 = vpack.c.bf16 %v888_v37, %v881_v6  ;;  %v909_v6 = vand.u32 4294901760, %v908_v52  ;;  %v4434_v52 = vld [vmem:[%s4917_s5 + $0x10] sm:$0xff] }
 0x142   :  { %v4369_v17 = vsub.f32 %v737_v59, %v4357_v15  ;;  %v894_v59 = vsub.f32 %v4350_v49, %v893_v20  ;;  %v916_v37 = vand.u32 4294901760, %v915_v10  ;;  %v4424_v10 = vld [vmem:[%s4917_s5] sm:$0xff] }
 0x143   :  { %v4383_v62 = vsub.f32 %v736_v0, %v4359_v54 }
 0x144   :  { %v854_v41 = vand.u32 4294901760, %v4369_v17  ;;  %v895_v5 = vand.u32 4294901760, %v894_v59  ;;  %v3365_v59 = vpack.c.bf16 %v916_v37, %v909_v6  ;;  %v4476_v6 = vld [vmem:[%s4917_s5 + $0x30] sm:$0xff]  ;;  %v4481_v37 = vld [vmem:[%s4917_s5 + $0x38] sm:$0xff] }
 0x145   :  { %v844_v2 = vand.u32 4294901760, %v4383_v62 }
 0x146   :  { %v855_v22 = vsub.f32 %v4369_v17, %v854_v41 }
 0x147   :  { %v845_v0 = vsub.f32 %v4383_v62, %v844_v2 }
 0x148   :  { %v856_v4 = vand.u32 4294901760, %v855_v22 }
 0x149   :  { %v846_v38 = vand.u32 4294901760, %v845_v0  ;;  %v3361_v0 = vpack.c.bf16 %v902_v57, %v895_v5  ;;  %v1471_v57 = vand.u32 4294901760, %v4424_v10  ;;  %v4926_v5 = vand.u32 4294901760, %v4434_v52 }
 0x14b   :  { %2741 = vmatprep.mubr.f32.mxu1 %v846_v38  ;;  %v4619_v36 = vsub.f32 %v4424_v10, %v1471_v57 }
 0x14c   :  { %2742 = vmatmul.mubr.f32.vlgmr.msra.gmra.mrb[2].mxu1 %v856_v4  ;;  %v4443_v4 = vld [vmem:[%s4917_s5 + $0x18] sm:$0xff] }
 0x14d   :  { %3356 = vmatpush3.bf16.msra.mxu1 %v4253_v24  ;;  %2776 = vmatprep.mubr.f32.mxu1 %v4359_v54  ;;  %v3389_v24 = vpack.c.bf16 %v4343_v34, %v4338_v18  ;;  %v4925_v22 = vand.u32 4294901760, %v4443_v4  ;;  %v4935_v18 = vand.u32 4294901760, %v4284_v25  ;;  %v1574_v20 = vand.u32 4294901760, %v4619_v36 }
 0x14e   :  { %3358 = vmatprep.subr.bf16.mxu1 %v3357_v1 }
 0x151   :  { %3360 = vmatpush3.bf16.msra.mxu1 %v3357_v1 }
 0x152   :  { %3362 = vmatprep.subr.bf16.mxu1 %v3361_v0 }
 0x155   :  { %3364 = vmatpush3.bf16.msra.mxu1 %v3361_v0  ;;  %v4471_v0 = vpack.c.bf16 %v4925_v22, %v4926_v5  ;;  %v1489_v5 = vand.u32 4294901760, %v4476_v6 }
 0x156   :  { %3366 = vmatprep.subr.bf16.mxu1 %v3365_v59 }
 0x159   :  { %3368 = vmatpush3.bf16.msra.mxu1 %v3365_v59  ;;  %v3397_v59 = vpack.c.bf16 %v4380_v45, %v4375_v30  ;;  %v1575_v30 = vsub.f32 %v4619_v36, %v1574_v20 }
 0x15a   :  { %3370 = vmatprep.subr.bf16.mxu1 %v4274_v13 }
 0x15d   :  { %3372 = vmatpush3.bf16.msra.mxu1 %v4274_v13  ;;  %v4429_v13 = vld [vmem:[%s4917_s5 + $0x8] sm:$0xff] }
 0x15e   :  { %3374 = vmatprep.subr.bf16.mxu1 %v4288_v58 }
 0x161   :  { %3376 = vmatpush3.bf16.msra.mxu1 %v4288_v58  ;;  %v4927_v58 = vand.u32 4294901760, %v4429_v13 }
 0x162   :  { %3378 = vmatprep.subr.bf16.mxu1 %v4308_v12 }
 0x163   :  { %v4463_v60 = vpack.c.bf16 %v4927_v58, %v1471_v57 }
 0x165   :  { %3380 = vmatpush3.bf16.msra.mxu1 %v4308_v12  ;;  %v4449_v12 = vld [vmem:[%s4917_s5 + $0x20] sm:$0xff]  ;;  %3514 = vmatprep.subr.bf16.mxu0 %v4463_v60 }
 0x166   :  { %3382 = vmatprep.subr.bf16.mxu1 %v4310_v44  ;;  %v1483_v38 = vand.u32 4294901760, %v4449_v12  ;;  %3516 = vmatpush3.bf16.msra.mxu0 %v4463_v60 }
 0x167   :  { %3518 = vmatprep.subr.bf16.mxu0 %v4471_v0 }
 0x169   :  { %3384 = vmatpush3.bf16.msra.mxu1 %v4310_v44  ;;  %v4454_v44 = vld [vmem:[%s4917_s5 + $0x28] sm:$0xff] }
 0x16a   :  { %3386 = vmatprep.subr.bf16.mxu1 %v4314_v51  ;;  %v1486_v1 = vand.u32 4294901760, %v4454_v44  ;;  %3520 = vmatpush3.bf16.msra.mxu0 %v4471_v0 }
 0x16c   :  { %2777 = vmatmul.mubr.f32.vlgmr.msra.gmra.mrb[2].mxu1 %v4357_v15  ;;  %v4492_v22 = vpack.c.bf16 %v1486_v1, %v1483_v38 }
 0x16d   :  { %3388 = vmatpush3.bf16.msra.mxu1 %v4314_v51  ;;  %2811 = vmatprep.mubr.f32.mxu1 %v4383_v62  ;;  %v3393_v51 = vpack.c.bf16 %v4355_v55, %v4350_v49  ;;  %v1461_v49 = vld [vmem:[%s4917_s5 + $0x70] sm:$0xff]  ;;  %v1462_v55 = vld [vmem:[%s4917_s5 + $0x78] sm:$0xff]  ;;  %v1576_v62 = vand.u32 4294901760, %v1575_v30 }
 0x16e   :  { %3390 = vmatprep.subr.bf16.mxu1 %v3389_v24  ;;  %3522 = vmatprep.subr.bf16.mxu0 %v4492_v22 }
 0x16f   :  { %3524 = vmatpush3.bf16.msra.mxu0 %v4492_v22 }
 0x171   :  { %3392 = vmatpush3.bf16.msra.mxu1 %v3389_v24  ;;  %v1492_v24 = vand.u32 4294901760, %v4481_v37 }
 0x172   :  { %3394 = vmatprep.subr.bf16.mxu1 %v3393_v51 }
 0x173   :  { %v4502_v58 = vpack.c.bf16 %v1492_v24, %v1489_v5 }
 0x175   :  { %3396 = vmatpush3.bf16.msra.mxu1 %v3393_v51  ;;  %3526 = vmatprep.subr.bf16.mxu0 %v4502_v58 }
 0x176   :  { %3398 = vmatprep.subr.bf16.mxu1 %v3397_v59  ;;  %3528 = vmatpush3.bf16.msra.mxu0 %v4502_v58 }
 0x179   :  { %3400 = vmatpush3.bf16.msra.mxu1 %v3397_v59 }
 0x17a   :  { %3402 = vmatprep.subr.bf16.mxu1 %v4318_v19 }
 0x17d   :  { %3404 = vmatpush3.bf16.msra.mxu1 %v4318_v19  ;;  %v3449_v19 = vpack.c.bf16 %v872_v43, %v865_v16  ;;  %v3465_v16 = vpack.c.bf16 %v928_v27, %v921_v33  ;;  %v4933_v43 = vand.u32 4294901760, %v4270_v31  ;;  %v3477_v33 = vpack.c.bf16 %v4937_v32, %v4936_v26  ;;  %v1459_v31 = vld [vmem:[%s4917_s5 + $0x60] sm:$0xff] }
 0x17e   :  { %3406 = vmatprep.subr.bf16.mxu1 %v4322_v21 }
 0x181   :  { %3408 = vmatpush3.bf16.msra.mxu1 %v4322_v21  ;;  %v3453_v21 = vpack.c.bf16 %v886_v14, %v879_v11  ;;  %v4938_v11 = vand.u32 4294901760, %v4429_v13 }
 0x182   :  { %3410 = vmatprep.subr.bf16.mxu1 %v4326_v47 }
 0x183   :  { %v4624_v14 = vsub.f32 %v4429_v13, %v4938_v11 }
 0x185   :  { %3412 = vmatpush3.bf16.msra.mxu1 %v4326_v47  ;;  %v3469_v47 = vpack.c.bf16 %v4933_v43, %v935_v39  ;;  %v1460_v39 = vld [vmem:[%s4917_s5 + $0x68] sm:$0xff] }
 0x186   :  { %3414 = vmatprep.subr.bf16.mxu1 %v4330_v48  ;;  %v1510_v25 = vand.u32 4294901760, %v1460_v39 }
 0x189   :  { %3416 = vmatpush3.bf16.msra.mxu1 %v4330_v48  ;;  %v4934_v48 = vand.u32 4294901760, %v4282_v23  ;;  %v1507_v23 = vand.u32 4294901760, %v1459_v31 }
 0x18a   :  { %3418 = vmatprep.subr.bf16.mxu1 %v4144_v46 }
 0x18b   :  { %v3473_v34 = vpack.c.bf16 %v4935_v18, %v4934_v48  ;;  %v4614_v63 = vpack.c.bf16 %v1510_v25, %v1507_v23  ;;  %v4675_v18 = vsub.f32 %v1459_v31, %v1507_v23 }
 0x18c   :  { %2812 = vmatmul.mubr.f32.vlgmr.msra.gmra.mrb[2].mxu1 %v4369_v17  ;;  %v1581_v17 = vand.u32 4294901760, %v4624_v14 }
 0x18d   :  { %3420 = vmatpush3.bf16.msra.mxu1 %v4144_v46  ;;  %2846 = vmatprep.mubr.f32.mxu1 %v844_v2 }
 0x18e   :  { %3422 = vmatprep.subr.bf16.mxu1 %v4164_v53  ;;  %v1582_v45 = vsub.f32 %v4624_v14, %v1581_v17 }
 0x191   :  { %3424 = vmatpush3.bf16.msra.mxu1 %v4164_v53 }
 0x192   :  { %3426 = vmatprep.subr.bf16.mxu1 %v4186_v56 }
 0x195   :  { %3428 = vmatpush3.bf16.msra.mxu1 %v4186_v56 }
 0x196   :  { %3430 = vmatprep.subr.bf16.mxu1 %v4196_v40 }
 0x199   :  { %3432 = vmatpush3.bf16.msra.mxu1 %v4196_v40 }
 0x19a   :  { %3434 = vmatprep.subr.bf16.mxu1 %v4207_v61 }
 0x19d   :  { %3436 = vmatpush3.bf16.msra.mxu1 %v4207_v61 }
 0x19e   :  { %3438 = vmatprep.subr.bf16.mxu1 %v4217_v3 }
 0x1a1   :  { %3440 = vmatpush3.bf16.msra.mxu1 %v4217_v3 }
 0x1a2   :  { %3442 = vmatprep.subr.bf16.mxu1 %v4227_v42 }
 0x1a5   :  { %3444 = vmatpush3.bf16.msra.mxu1 %v4227_v42 }
 0x1a6   :  { %3446 = vmatprep.subr.bf16.mxu1 %v4243_v50 }
 0x1a9   :  { %3448 = vmatpush3.bf16.msra.mxu1 %v4243_v50 }
 0x1aa   :  { %3450 = vmatprep.subr.bf16.mxu1 %v3449_v19 }
 0x1ac   :  { %2847 = vmatmul.mubr.f32.vlgmr.msra.gmra.mrb[2].mxu1 %v854_v41  ;;  %v1583_v41 = vand.u32 4294901760, %v1582_v45 }
 0x1ad   :  { %3452 = vmatpush3.bf16.msra.mxu1 %v3449_v19  ;;  %2881 = vmatprep.mubr.f32.mxu1 %v4359_v54 }
 0x1ae   :  { %3454 = vmatprep.subr.bf16.mxu1 %v3453_v21  ;;  %v4646_v2 = vpack.c.bf16 %v1583_v41, %v1576_v62 }
 0x1b1   :  { %3456 = vmatpush3.bf16.msra.mxu1 %v3453_v21 }
 0x1b2   :  { %3458 = vmatprep.subr.bf16.mxu1 %v3457_v7 }
 0x1b5   :  { %3460 = vmatpush3.bf16.msra.mxu1 %v3457_v7 }
 0x1b6   :  { %3462 = vmatprep.subr.bf16.mxu1 %v3461_v9 }
 0x1b9   :  { %3464 = vmatpush3.bf16.msra.mxu1 %v3461_v9 }
 0x1ba   :  { %3466 = vmatprep.subr.bf16.mxu1 %v3465_v16 }
 0x1bd   :  { %3468 = vmatpush3.bf16.msra.mxu1 %v3465_v16 }
 0x1be   :  { %3470 = vmatprep.subr.bf16.mxu1 %v3469_v47 }
 0x1c1   :  { %3472 = vmatpush3.bf16.msra.mxu1 %v3469_v47 }
 0x1c2   :  { %3474 = vmatprep.subr.bf16.mxu1 %v3473_v34 }
 0x1c5   :  { %3476 = vmatpush3.bf16.msra.mxu1 %v3473_v34  ;;  %v4677_v34 = vsub.f32 %v1460_v39, %v1510_v25 }
 0x1c6   :  { %3478 = vmatprep.subr.bf16.mxu1 %v3477_v33 }
 0x1c7   :  { %v4719_v62 = vpack.c.bf16 %v4677_v34, %v4675_v18 }
 0x1c9   :  { %3480 = vmatpush3.bf16.msra.mxu1 %v3477_v33  ;;  %v4931_v33 = vand.u32 4294901760, %v4675_v18 }
 0x1ca   :  { %3482 = vmatprep.subr.bf16.mxu1 %v4144_v46 }
 0x1cc   :  { %2882 = vmatmul.mubr.f32.vlgmr.msra.gmra.mrb[2].mxu1 %v4357_v15 }
 0x1cd   :  { %3484 = vmatpush3.bf16.msra.mxu1 %v4144_v46  ;;  %2916 = vmatprep.mubr.f32.mxu1 %v4359_v54  ;;  %v1455_v46 = vld [vmem:[%s4917_s5 + $0x40] sm:$0xff]  ;;  %v1516_v54 = vand.u32 4294901760, %v1462_v55 }
 0x1ce   :  { %3486 = vmatprep.subr.bf16.mxu1 %v4164_v53 }
 0x1d1   :  { %3488 = vmatpush3.bf16.msra.mxu1 %v4164_v53  ;;  %v1456_v53 = vld [vmem:[%s4917_s5 + $0x48] sm:$0xff] }
 0x1d2   :  { %3490 = vmatprep.subr.bf16.mxu1 %v4186_v56 }
 0x1d5   :  { %3492 = vmatpush3.bf16.msra.mxu1 %v4186_v56  ;;  %v1495_v56 = vand.u32 4294901760, %v1455_v46 }
 0x1d6   :  { %3494 = vmatprep.subr.bf16.mxu1 %v4196_v40 }
 0x1d7   :  { %v4649_v29 = vsub.f32 %v1455_v46, %v1495_v56  ;;  %v4930_v46 = vand.u32 4294901760, %v4677_v34 }
 0x1d9   :  { %3496 = vmatpush3.bf16.msra.mxu1 %v4196_v40  ;;  %v1498_v40 = vand.u32 4294901760, %v1456_v53  ;;  %v1630_v10 = vand.u32 4294901760, %v4649_v29 }
 0x1da   :  { %3498 = vmatprep.subr.bf16.mxu1 %v4207_v61 }
 0x1db   :  { %v4651_v35 = vsub.f32 %v1456_v53, %v1498_v40  ;;  %v1631_v57 = vsub.f32 %v4649_v29, %v1630_v10 }
 0x1dd   :  { %3500 = vmatpush3.bf16.msra.mxu1 %v4207_v61  ;;  %v4594_v61 = vpack.c.bf16 %v1498_v40, %v1495_v56  ;;  %v1637_v13 = vand.u32 4294901760, %v4651_v35  ;;  %v1632_v21 = vand.u32 4294901760, %v1631_v57  ;;  %v1659_v56 = vsub.f32 %v4675_v18, %v4931_v33  ;;  %v2173_v57 = vld [vmem:[%s4916_s4] ss:$0 sm:$0xff] }
 0x1de   :  { %3502 = vmatprep.subr.bf16.mxu1 %v4217_v3  ;;  %v4711_v30 = vpack.c.bf16 %v4651_v35, %v4649_v29 }
 0x1df   :  { %3530 = vmatprep.subr.bf16.mxu0 %v4594_v61  ;;  %v1638_v51 = vsub.f32 %v4651_v35, %v1637_v13 }
 0x1e0   :  { %3532 = vmatpush3.bf16.msra.mxu0 %v4594_v61 }
 0x1e1   :  { %3504 = vmatpush3.bf16.msra.mxu1 %v4217_v3  ;;  %v1457_v3 = vld [vmem:[%s4917_s5 + $0x50] sm:$0xff]  ;;  %v1639_v7 = vand.u32 4294901760, %v1638_v51  ;;  %v4939_v51 = vand.u32 4294901760, %v4434_v52 }
 0x1e2   :  { %3506 = vmatprep.subr.bf16.mxu1 %v4227_v42 }
 0x1e3   :  { %v4667_v43 = vpack.c.bf16 %v1639_v7, %v1632_v21  ;;  %v4731_v21 = vsub.f32 %v4434_v52, %v4939_v51  ;;  %v4940_v7 = vand.u32 4294901760, %v4443_v4  ;;  %v4773_v51 = vsub.f32 %v4481_v37, %v1492_v24 }
 0x1e5   :  { %3508 = vmatpush3.bf16.msra.mxu1 %v4227_v42  ;;  %v1458_v42 = vld [vmem:[%s4917_s5 + $0x58] sm:$0xff]  ;;  %v1623_v24 = vand.u32 4294901760, %v4773_v51 }
 0x1e6   :  { %3510 = vmatprep.subr.bf16.mxu1 %v4243_v50  ;;  %v1504_v27 = vand.u32 4294901760, %v1458_v42 }
 0x1e8   :  { %v4663_v19 = vsub.f32 %v1458_v42, %v1504_v27  ;;  %v1666_v42 = vsub.f32 %v4677_v34, %v4930_v46 }
 0x1e9   :  { %3512 = vmatpush3.bf16.msra.mxu1 %v4243_v50  ;;  %v1501_v50 = vand.u32 4294901760, %v1457_v3 }
 0x1ea   :  { %v4932_v16 = vand.u32 4294901760, %v4663_v19  ;;  %v1667_v39 = vand.u32 4294901760, %v1666_v42  ;;  %v1588_v42 = vand.u32 4294901760, %v4731_v21 }
 0x1eb   :  { %v4604_v28 = vpack.c.bf16 %v1504_v27, %v1501_v50  ;;  %v4661_v59 = vsub.f32 %v1457_v3, %v1501_v50  ;;  %v4688_v3 = vsub.f32 %v1462_v55, %v1516_v54  ;;  %v1660_v50 = vand.u32 4294901760, %v1659_v56 }
 0x1ec   :  { %2917 = vmatmul.mubr.f32.vlgmr.msra.gmra.mrb[2].mxu1 %v4357_v15  ;;  %v1513_v15 = vand.u32 4294901760, %v1461_v49  ;;  %v1652_v48 = vsub.f32 %v4663_v19, %v4932_v16  ;;  %v1624_v16 = vsub.f32 %v4773_v51, %v1623_v24 }
 0x1ed   :  { %3534 = vmatprep.subr.bf16.mxu0 %v4604_v28  ;;  %v1644_v9 = vand.u32 4294901760, %v4661_v59  ;;  %v4928_v31 = vand.u32 4294901760, %v4688_v3  ;;  %v4701_v11 = vpack.c.bf16 %v1667_v39, %v1660_v50  ;;  %v4715_v45 = vpack.c.bf16 %v4663_v19, %v4661_v59 }
 0x1ee   :  { %3536 = vmatpush3.bf16.msra.mxu0 %v4604_v28  ;;  %v4636_v8 = vpack.c.bf16 %v1516_v54, %v1513_v15  ;;  %v1653_v32 = vand.u32 4294901760, %v1652_v48  ;;  %v4686_v40 = vsub.f32 %v1461_v49, %v1513_v15  ;;  %v4707_v54 = vpack.c.bf16 %v4624_v14, %v4619_v36 }
 0x1ef   :  { %3538 = vmatprep.subr.bf16.mxu0 %v4614_v63  ;;  %v1645_v47 = vsub.f32 %v4661_v59, %v1644_v9  ;;  %v1680_v25 = vsub.f32 %v4688_v3, %v4928_v31  ;;  %v4743_v39 = vsub.f32 %v4449_v12, %v1483_v38  ;;  %v4945_v35 = vand.u32 4294901760, %v4688_v3 }
 0x1f0   :  { %v4929_v27 = vand.u32 4294901760, %v4686_v40  ;;  %v4723_v41 = vpack.c.bf16 %v4688_v3, %v4686_v40  ;;  %v4944_v29 = vand.u32 4294901760, %v4686_v40 }
 0x1f1   :  { %v1646_v26 = vand.u32 4294901760, %v1645_v47  ;;  %v1681_v55 = vand.u32 4294901760, %v1680_v25  ;;  %v4736_v47 = vsub.f32 %v4443_v4, %v4940_v7  ;;  %v1602_v38 = vand.u32 4294901760, %v4743_v39 }
 0x1f2   :  { %3540 = vmatpush3.bf16.msra.mxu0 %v4614_v63  ;;  %v1673_v23 = vsub.f32 %v4686_v40, %v4929_v27 }
 0x1f3   :  { %3542 = vmatprep.subr.bf16.mxu0 %v4636_v8  ;;  %v4681_v53 = vpack.c.bf16 %v1653_v32, %v1646_v26  ;;  %v1595_v50 = vand.u32 4294901760, %v4736_v47 }
 0x1f4   :  { %v1674_v49 = vand.u32 4294901760, %v1673_v23  ;;  %v4748_v23 = vsub.f32 %v4454_v44, %v1486_v1  ;;  %v4768_v1 = vsub.f32 %v4476_v6, %v1489_v5 }
 0x1f5   :  { %v1596_v12 = vsub.f32 %v4736_v47, %v1595_v50 }
 0x1f6   :  { %3544 = vmatpush3.bf16.msra.mxu0 %v4636_v8  ;;  %v4703_v15 = vpack.c.bf16 %v1681_v55, %v1674_v49  ;;  %v1589_v55 = vsub.f32 %v4731_v21, %v1588_v42  ;;  %v1609_v44 = vand.u32 4294901760, %v4748_v23  ;;  %v1616_v37 = vand.u32 4294901760, %v4768_v1 }
 0x1f7   :  { %3546 = vmatprep.subr.bf16.mxu0 %v4646_v2 }
 0x1f8   :  { %v1610_v6 = vsub.f32 %v4748_v23, %v1609_v44  ;;  %v1617_v33 = vsub.f32 %v4768_v1, %v1616_v37  ;;  %v3649_v36 = vpack.c.bf16 %v1609_v44, %v1602_v38  ;;  %v3653_v14 = vpack.c.bf16 %v1623_v24, %v1616_v37 }
 0x1fa   :  { %v1611_v46 = vand.u32 4294901760, %v1610_v6 }
 0x2bf   :  { %v2918_v48 = vpop.f32.mrb[2].mxu1 }
 0x2c0   :  { %v3709_v26 = vadd.f32 %v2918_v48, %v2173_v57  ;;  %v1435_v32 = vpop.f32.mrb[3].mxu1 }
 0x2c1   :  { %v3710_v56 = vadd.f32 %v2173_v57, %v1435_v32  ;;  %v1590_v32 = vand.u32 4294901760, %v1589_v55 }
 0x2c2   :  { %v1446_v52 = vmax.f32 %v3709_v26, 0.0 }
 0x2c3   :  { %v1445_v4 = vmax.f32 %v3710_v56, 0.0  ;;  %v1597_v56 = vand.u32 4294901760, %v1596_v12 }
 0x2c4   :  { %v4750_v25 = vand.u32 4294901760, %v1446_v52 }
 0x2c5   :  { %v4752_v49 = vand.u32 4294901760, %v1445_v4  ;;  %v3549_v12 = vpack.c.bf16 %v1597_v56, %v1590_v32  ;;  %v1618_v32 = vand.u32 4294901760, %v1617_v33  ;;  %v1625_v56 = vand.u32 4294901760, %v1624_v16 }
 0x2c6   :  { %v4762_v57 = vsub.f32 %v1446_v52, %v4750_v25  ;;  %v1603_v52 = vsub.f32 %v4743_v39, %v1602_v38  ;;  %v3585_v16 = vpack.c.bf16 %v4748_v23, %v4743_v39  ;;  %v3641_v33 = vpack.c.bf16 %v1581_v17, %v1574_v20 }
 0x2c7   :  { %v4776_v7 = vsub.f32 %v1445_v4, %v4752_v49  ;;  %v3657_v20 = vpack.c.bf16 %v1637_v13, %v1630_v10  ;;  %v4941_v17 = vand.u32 4294901760, %v4663_v19  ;;  %v3669_v10 = vpack.c.bf16 %v4945_v35, %v4944_v29 }
 0x2c8   :  { %v1563_v48 = vand.u32 4294901760, %v4762_v57  ;;  %v1604_v31 = vand.u32 4294901760, %v1603_v52  ;;  %v3557_v52 = vpack.c.bf16 %v1625_v56, %v1618_v32 }
 0x2c9   :  { %v1553_v26 = vand.u32 4294901760, %v4776_v7 }
 0x2ca   :  { %v1564_v5 = vsub.f32 %v4762_v57, %v1563_v48 }
 0x2cb   :  { %v1554_v4 = vsub.f32 %v4776_v7, %v1553_v26 }
 0x2cc   :  { %v1565_v27 = vand.u32 4294901760, %v1564_v5 }
 0x2cd   :  { %v1555_v55 = vand.u32 4294901760, %v1554_v4  ;;  %v3553_v4 = vpack.c.bf16 %v1611_v46, %v1604_v31  ;;  %v3645_v46 = vpack.c.bf16 %v1595_v50, %v1588_v42  ;;  %v4943_v31 = vand.u32 4294901760, %v4677_v34 }
 0x2cf   :  { %2951 = vmatprep.mubr.f32.mxu0 %v1555_v55 }
 0x2d0   :  { %2952 = vmatmul.mubr.f32.vlgmr.msra.gmra.mrb[2].mxu0 %v1565_v27  ;;  %v4942_v27 = vand.u32 4294901760, %v4675_v18 }
 0x2d1   :  { %3548 = vmatpush3.bf16.msra.mxu0 %v4646_v2  ;;  %2986 = vmatprep.mubr.f32.mxu0 %v4752_v49  ;;  %v3581_v2 = vpack.c.bf16 %v4736_v47, %v4731_v21 }
 0x2d2   :  { %3550 = vmatprep.subr.bf16.mxu0 %v3549_v12 }
 0x2d5   :  { %3552 = vmatpush3.bf16.msra.mxu0 %v3549_v12 }
 0x2d6   :  { %3554 = vmatprep.subr.bf16.mxu0 %v3553_v4 }
 0x2d9   :  { %3556 = vmatpush3.bf16.msra.mxu0 %v3553_v4 }
 0x2da   :  { %3558 = vmatprep.subr.bf16.mxu0 %v3557_v52 }
 0x2dd   :  { %3560 = vmatpush3.bf16.msra.mxu0 %v3557_v52 }
 0x2de   :  { %3562 = vmatprep.subr.bf16.mxu0 %v4667_v43 }
 0x2e1   :  { %3564 = vmatpush3.bf16.msra.mxu0 %v4667_v43  ;;  %v3589_v43 = vpack.c.bf16 %v4773_v51, %v4768_v1 }
 0x2e2   :  { %3566 = vmatprep.subr.bf16.mxu0 %v4681_v53 }
 0x2e5   :  { %3568 = vmatpush3.bf16.msra.mxu0 %v4681_v53  ;;  %v3661_v53 = vpack.c.bf16 %v4941_v17, %v1644_v9 }
 0x2e6   :  { %3570 = vmatprep.subr.bf16.mxu0 %v4701_v11 }
 0x2e9   :  { %3572 = vmatpush3.bf16.msra.mxu0 %v4701_v11  ;;  %v3665_v11 = vpack.c.bf16 %v4943_v31, %v4942_v27 }
 0x2ea   :  { %3574 = vmatprep.subr.bf16.mxu0 %v4703_v15 }
 0x2ed   :  { %3576 = vmatpush3.bf16.msra.mxu0 %v4703_v15 }
 0x2ee   :  { %3578 = vmatprep.subr.bf16.mxu0 %v4707_v54 }
 0x2f0   :  { %2987 = vmatmul.mubr.f32.vlgmr.msra.gmra.mrb[2].mxu0 %v4750_v25 }
 0x2f1   :  { %3580 = vmatpush3.bf16.msra.mxu0 %v4707_v54  ;;  %3021 = vmatprep.mubr.f32.mxu0 %v4776_v7 }
 0x2f2   :  { %3582 = vmatprep.subr.bf16.mxu0 %v3581_v2 }
 0x2f5   :  { %3584 = vmatpush3.bf16.msra.mxu0 %v3581_v2 }
 0x2f6   :  { %3586 = vmatprep.subr.bf16.mxu0 %v3585_v16 }
 0x2f9   :  { %3588 = vmatpush3.bf16.msra.mxu0 %v3585_v16 }
 0x2fa   :  { %3590 = vmatprep.subr.bf16.mxu0 %v3589_v43 }
 0x2fd   :  { %3592 = vmatpush3.bf16.msra.mxu0 %v3589_v43 }
 0x2fe   :  { %3594 = vmatprep.subr.bf16.mxu0 %v4711_v30 }
 0x301   :  { %3596 = vmatpush3.bf16.msra.mxu0 %v4711_v30 }
 0x302   :  { %3598 = vmatprep.subr.bf16.mxu0 %v4715_v45 }
 0x305   :  { %3600 = vmatpush3.bf16.msra.mxu0 %v4715_v45 }
 0x306   :  { %3602 = vmatprep.subr.bf16.mxu0 %v4719_v62 }
 0x309   :  { %3604 = vmatpush3.bf16.msra.mxu0 %v4719_v62 }
 0x30a   :  { %3606 = vmatprep.subr.bf16.mxu0 %v4723_v41 }
 0x30d   :  { %3608 = vmatpush3.bf16.msra.mxu0 %v4723_v41 }
 0x30e   :  { %3610 = vmatprep.subr.bf16.mxu0 %v4463_v60 }
 0x310   :  { %3022 = vmatmul.mubr.f32.vlgmr.msra.gmra.mrb[2].mxu0 %v4762_v57 }
 0x311   :  { %3612 = vmatpush3.bf16.msra.mxu0 %v4463_v60  ;;  %3056 = vmatprep.mubr.f32.mxu0 %v1553_v26 }
 0x312   :  { %3614 = vmatprep.subr.bf16.mxu0 %v4471_v0 }
 0x315   :  { %3616 = vmatpush3.bf16.msra.mxu0 %v4471_v0 }
 0x316   :  { %3618 = vmatprep.subr.bf16.mxu0 %v4492_v22 }
 0x319   :  { %3620 = vmatpush3.bf16.msra.mxu0 %v4492_v22 }
 0x31a   :  { %3622 = vmatprep.subr.bf16.mxu0 %v4502_v58 }
 0x31d   :  { %3624 = vmatpush3.bf16.msra.mxu0 %v4502_v58 }
 0x31e   :  { %3626 = vmatprep.subr.bf16.mxu0 %v4594_v61 }
 0x321   :  { %3628 = vmatpush3.bf16.msra.mxu0 %v4594_v61 }
 0x322   :  { %3630 = vmatprep.subr.bf16.mxu0 %v4604_v28 }
 0x325   :  { %3632 = vmatpush3.bf16.msra.mxu0 %v4604_v28 }
 0x326   :  { %3634 = vmatprep.subr.bf16.mxu0 %v4614_v63 }
 0x329   :  { %3636 = vmatpush3.bf16.msra.mxu0 %v4614_v63 }
 0x32a   :  { %3638 = vmatprep.subr.bf16.mxu0 %v4636_v8 }
 0x32d   :  { %3640 = vmatpush3.bf16.msra.mxu0 %v4636_v8 }
 0x32e   :  { %3642 = vmatprep.subr.bf16.mxu0 %v3641_v33 }
 0x330   :  { %3057 = vmatmul.mubr.f32.vlgmr.msra.gmra.mrb[2].mxu0 %v1563_v48 }
 0x331   :  { %3644 = vmatpush3.bf16.msra.mxu0 %v3641_v33  ;;  %3091 = vmatprep.mubr.f32.mxu0 %v4752_v49 }
 0x332   :  { %3646 = vmatprep.subr.bf16.mxu0 %v3645_v46 }
 0x335   :  { %3648 = vmatpush3.bf16.msra.mxu0 %v3645_v46 }
 0x336   :  { %3650 = vmatprep.subr.bf16.mxu0 %v3649_v36 }
 0x339   :  { %3652 = vmatpush3.bf16.msra.mxu0 %v3649_v36 }
 0x33a   :  { %3654 = vmatprep.subr.bf16.mxu0 %v3653_v14 }
 0x33d   :  { %3656 = vmatpush3.bf16.msra.mxu0 %v3653_v14 }
 0x33e   :  { %3658 = vmatprep.subr.bf16.mxu0 %v3657_v20 }
 0x341   :  { %3660 = vmatpush3.bf16.msra.mxu0 %v3657_v20 }
 0x342   :  { %3662 = vmatprep.subr.bf16.mxu0 %v3661_v53 }
 0x345   :  { %3664 = vmatpush3.bf16.msra.mxu0 %v3661_v53 }
 0x346   :  { %3666 = vmatprep.subr.bf16.mxu0 %v3665_v11 }
 0x349   :  { %3668 = vmatpush3.bf16.msra.mxu0 %v3665_v11 }
 0x34a   :  { %3670 = vmatprep.subr.bf16.mxu0 %v3669_v10 }
 0x34d   :  { %3672 = vmatpush3.bf16.msra.mxu0 %v3669_v10 }
 0x34e   :  { %3674 = vmatprep.subr.bf16.mxu0 %v4463_v60 }
 0x350   :  { %3092 = vmatmul.mubr.f32.vlgmr.msra.gmra.mrb[2].mxu0 %v4750_v25 }
 0x351   :  { %3676 = vmatpush3.bf16.msra.mxu0 %v4463_v60  ;;  %3126 = vmatprep.mubr.f32.mxu0 %v4752_v49 }
 0x352   :  { %3678 = vmatprep.subr.bf16.mxu0 %v4471_v0 }
 0x355   :  { %3680 = vmatpush3.bf16.msra.mxu0 %v4471_v0 }
 0x356   :  { %3682 = vmatprep.subr.bf16.mxu0 %v4492_v22 }
 0x359   :  { %3684 = vmatpush3.bf16.msra.mxu0 %v4492_v22 }
 0x35a   :  { %3686 = vmatprep.subr.bf16.mxu0 %v4502_v58 }
 0x35d   :  { %3688 = vmatpush3.bf16.msra.mxu0 %v4502_v58  ;;  %v2174_v58 = vld [vmem:[%s4918_s6] ss:$0 sm:$0xff] }
 0x35e   :  { %3690 = vmatprep.subr.bf16.mxu0 %v4594_v61 }
 0x361   :  { %3692 = vmatpush3.bf16.msra.mxu0 %v4594_v61 }
 0x362   :  { %3694 = vmatprep.subr.bf16.mxu0 %v4604_v28 }
 0x365   :  { %3696 = vmatpush3.bf16.msra.mxu0 %v4604_v28 }
 0x366   :  { %3698 = vmatprep.subr.bf16.mxu0 %v4614_v63 }
 0x369   :  { %3700 = vmatpush3.bf16.msra.mxu0 %v4614_v63 }
 0x36a   :  { %3702 = vmatprep.subr.bf16.mxu0 %v4636_v8 }
 0x36d   :  { %3704 = vmatpush3.bf16.msra.mxu0 %v4636_v8 }
 0x370   :  { %3127 = vmatmul.mubr.f32.vlgmr.msra.gmra.mrb[2].mxu0 %v4750_v25 }
 0x443   :  { %v3128_v22 = vpop.f32.mrb[2].mxu0 }
 0x444   :  { %v3711_v60 = vadd.f32 %v3128_v22, %v2174_v58  ;;  %v2144_v0 = vpop.f32.mrb[3].mxu0 }
 0x445   :  { %v3712_v61 = vadd.f32 %v2174_v58, %v2144_v0 }
 0x446   :  { %2155 = vst [vmem:[#allocation2 + $0x8] sm:$0xff] %v3711_v60 }
 0x447   :  { %2154 = vst [vmem:[#allocation2] sm:$0xff] %v3712_v61 }
 0x448   :  { %3755 = shalt.err (!%p3752_p4)
}
 0x449   :  { %s3756_s6 = scalar_lea.hbm %s4919_s7, 256 }
 0x44a   :  { %p3757_p5 = scmp.ne.s32.totalorder %s4919_s7, %s3756_s6  ;;  %p3760_p6 = scmp.lt.u32.totalorder %s3756_s6, %s4919_s7 }
 0x44c   :  { %p3762_p7 = pnand %p3760_p6, %p3757_p5 }
 0x44e   :  { %3765 = shalt.err (!%p3762_p7)
}
 0x44f   :  { %s3769_s11 = smov 128   ;;  %s3770_s12 = smov 8  }
 0x450   :  { %2167 = dma.vmem_to_hbm [thread:$0]  %s2162_s27, 256, %s4919_s7, [#allocation3], %s3769_s11, %s3769_s11, %s3770_s12  }
 0x451   :  { %3766 = dma.done.wait [#allocation3], 256  }
 0x452   :  { %3767 = vsyncadd [#allocation3], 4294967040 }
 0x453   :  { %2171 = vsyncpa [#allocation3], 1 }

</bundles_post_ra>
